<compile_context>
chip_gen: v7x
topology: tpu7x:2x2x1
jax: 0.10.0
libtpu: 0.0.40
codegen_flags: <defaults>
</compile_context>

<pallas_src>
import math

import jax
import jax.numpy as jnp
from jax.experimental import pallas as pl
from jax.experimental.pallas import tpu as pltpu

_HALF_LOG_2PI = 0.5 * math.log(2.0 * math.pi)

_DEFAULT_OUT_BLOCK_BYTES = 4 * 1024 * 1024   # ~4 MiB output blocks (good on v5e/v6e/v7x)
_VMEM_LIMIT_BYTES = 40 * 1024 * 1024         # explicit scoped-VMEM budget (fits v7x's 64 MiB)
_MAX_EXPAND_BYTES = 2 * 1024 * 1024          # max size of the MXU expansion matrix E


def _cdiv(a, b):
    return -(-a // b)


def _round_up(v, m):
    return _cdiv(v, m) * m


# ---------------------------------------------------------------------------
# Kernels (both write a lane-dense (TN, D*M) block)
# ---------------------------------------------------------------------------
def _normal_logprob_mxu_kernel(x_ref, e_ref, p_ref, out_ref):
    """MXU-expansion kernel.

    x_ref:   (TN, D)     batch tile
    e_ref:   (D, D*M)    0/1 expansion matrix, E[d, d*M+m] = 1   (grid-resident)
    p_ref:   (3, D*M)    rows: mu, a=-0.5/sigma^2, b=-(log sigma + 0.5*log2pi)
    out_ref: (TN, D*M)   lane-dense log-prob slab

    (x @ E)[n, d*M+m] == x[n, d] exactly (single nonzero product per output,
    precision=HIGHEST keeps f32 fidelity), so this is numerically the same
    computation as the reference, with the expansion done on the idle MXU
    instead of a lane-merge reshape.
    """
    x_rep = jnp.dot(
        x_ref[...], e_ref[...],
        preferred_element_type=jnp.float32,
        precision=jax.lax.Precision.HIGHEST,
    )                                                   # (TN, D*M)
    mu = p_ref[0:1, :]
    a = p_ref[1:2, :]
    b = p_ref[2:3, :]
    diff = x_rep - mu
    out_ref[...] = (diff * diff * a + b).astype(out_ref.dtype)


def _normal_logprob_slice_kernel(x_ref, p_ref, out_ref):
    """Fallback (large D*D*M): per-feature slice loop, still lane-dense output.

    Stores of width M are masked when M < 128, but the HBM writeback block stays
    a dense (TN, D*M) slab.  Unrolled over D, so intended for moderate D only.
    """
    tn, d = x_ref.shape
    dm = out_ref.shape[-1]
    m = dm // d
    x = x_ref[...]
    p = p_ref[...]                                      # (3, D*M), tiny
    for di in range(d):
        lo = di * m
        mu = p[0:1, lo:lo + m]
        a = p[1:2, lo:lo + m]
        b = p[2:3, lo:lo + m]
        diff = x[:, di:di + 1] - mu                     # (TN, M)
        out_ref[:, lo:lo + m] = (diff * diff * a + b).astype(out_ref.dtype)


# ---------------------------------------------------------------------------
# Tiling / pallas_call wrapper
# ---------------------------------------------------------------------------
def _pick_batch_tile(n, row_bytes, requested=None,
                     out_block_bytes=_DEFAULT_OUT_BLOCK_BYTES):
    """Pick a batch tile TN that is a multiple of 8, keeps the output block around
    `out_block_bytes` (sized from the real output itemsize), and — when N allows —
    yields >= 4 grid steps with an even count so the DMA pipeline overlaps and the
    'parallel' batch axis splits evenly across v7x's two TensorCores."""
    if requested is not None:
        if requested <= 0 or requested % 8:
            raise ValueError(
                f"batch_tile must be a positive multiple of 8, got {requested}")
        return requested
    n8 = _round_up(max(n, 1), 8)
    budget_rows = max(8, (out_block_bytes // max(row_bytes, 1)) // 8 * 8)
    tn = min(n8, budget_rows)
    if n8 >= 32:
        # At least 4 grid steps (pipeline overlap + megacore work for each TC).
        tn = min(tn, _round_up(_cdiv(n8, 4), 8))
        steps = _cdiv(n8, tn)
        if steps % 2:  # prefer an even split across the two v7x TensorCores
            tn = max(8, _round_up(_cdiv(n8, steps + 1), 8))
    return tn


def _lane_dense_call(kernel, inputs, in_specs, n_pad, dm, tn, out_dtype):
    grid_steps = n_pad // tn
    return pl.pallas_call(
        kernel,
        out_shape=jax.ShapeDtypeStruct((n_pad, dm), out_dtype),
        grid_spec=pltpu.PrefetchScalarGridSpec(
            num_scalar_prefetch=0,
            grid=(grid_steps,),
            in_specs=in_specs,
            out_specs=pl.BlockSpec((tn, dm), lambda i: (i, 0)),
        ),
        compiler_params=pltpu.CompilerParams(
            dimension_semantics=("parallel",),
            vmem_limit_bytes=_VMEM_LIMIT_BYTES,
        ),
    )(*inputs)


def normal_leaf_forward(x, means, stds, *, batch_tile=None,
                        out_dtype=jnp.float32,
                        out_block_bytes=_DEFAULT_OUT_BLOCK_BYTES,
                        impl="auto"):
    """Normal leaf layer forward pass.

    Args:
      x:     [N, D] float inputs.
      means: [D, M] (or the module's [1, D, M]) means.
      stds:  [D, M] (or [1, D, M]) positive scales.
      batch_tile: optional explicit batch tile (positive multiple of 8).
      out_dtype: float32 matches the torch module exactly; jnp.bfloat16 halves HBM
        write traffic (this kernel is >95% output-write bound) if downstream allows.
      out_block_bytes: target output block size (raise to ~8 MiB on v7x if desired).
      impl: "auto" | "mxu" | "slice".

    Returns:
      log-probabilities [N, D, M].
    """
    x = jnp.asarray(x, jnp.float32)
    means = jnp.asarray(means, jnp.float32)
    stds = jnp.asarray(stds, jnp.float32)
    if means.ndim == 3:          # module parameter shape (1, D, M)
        means = means[0]
    if stds.ndim == 3:
        stds = stds[0]

    n, d = x.shape
    d2, m = means.shape
    if d2 != d or stds.shape != (d, m):
        raise ValueError("means/stds must be (D, M) matching x's feature dim")
    dm = d * m

    # Hoisted parameter math (tiny [D, M] tensors, computed once outside the hot
    # loop):  log_prob = (x - mu)^2 * a + b
    a = -0.5 / (stds * stds)
    b = -(jnp.log(stds) + _HALF_LOG_2PI)
    params = jnp.stack(
        [means.reshape(dm), a.reshape(dm), b.reshape(dm)], axis=0)   # (3, D*M)

    out_itemsize = jnp.dtype(out_dtype).itemsize
    tn = _pick_batch_tile(n, dm * out_itemsize, batch_tile, out_block_bytes)

    grid_steps = _cdiv(n, tn)
    n_pad = grid_steps * tn
    if n_pad != n:               # ragged batch: pad up, slice result afterwards
        x = jnp.pad(x, ((0, n_pad - n), (0, 0)))

    # Static, shape-based path choice (no runtime probe, no global state).
    if impl == "auto":
        impl = "mxu" if (d * dm * 4 <= _MAX_EXPAND_BYTES and d <= 256) else "slice"

    if impl == "mxu":
        # 0/1 expansion matrix: (x @ E)[n, d*M + m] == x[n, d] exactly.
        e = (jnp.arange(dm, dtype=jnp.int32)[None, :] // m
             == jnp.arange(d, dtype=jnp.int32)[:, None]).astype(jnp.float32)
        out_flat = _lane_dense_call(
            _normal_logprob_mxu_kernel,
            (x, e, params),
            [
                pl.BlockSpec((tn, d), lambda i: (i, 0)),
                pl.BlockSpec((d, dm), lambda i: (0, 0)),   # VMEM-resident
                pl.BlockSpec((3, dm), lambda i: (0, 0)),   # VMEM-resident
            ],
            n_pad, dm, tn, out_dtype)
    elif impl == "slice":
        out_flat = _lane_dense_call(
            _normal_logprob_slice_kernel,
            (x, params),
            [
                pl.BlockSpec((tn, d), lambda i: (i, 0)),
                pl.BlockSpec((3, dm), lambda i: (0, 0)),   # VMEM-resident
            ],
            n_pad, dm, tn, out_dtype)
    else:
        raise ValueError(f"unknown impl {impl!r}")

    return out_flat[:n].reshape(n, d, m)


# ---------------------------------------------------------------------------
# Pure-JAX reference (matches torch.distributions.Normal.log_prob semantics)
# ---------------------------------------------------------------------------
def reference_normal_logprob(x, means, stds):
    xb = x[:, :, None]                         # (N, D, 1)
    mu = means[None, :, :]                     # (1, D, M)
    sigma = stds[None, :, :]                   # (1, D, M)
    return (-((xb - mu) ** 2) / (2.0 * sigma ** 2)
            - jnp.log(sigma) - _HALF_LOG_2PI)


if __name__ == "__main__":
    # Small, module-consistent shapes: ragged batch N=37, in_features D=16,
    # multiplicity M=32 (exercises padding and a multi-step grid).
    N, D, M = 37, 16, 32

    key = jax.random.PRNGKey(0)
    k_means, k_stds, k_x = jax.random.split(key, 3)

    # Deterministic parameter init mirroring the PyTorch module:
    #   means = randn(1, D, M);  stds = rand(1, D, M), kept away from 0 for
    #   numerical sanity (sigma ~ 0 gives +/-inf identically to the reference).
    means = jax.random.normal(k_means, (D, M), dtype=jnp.float32)
    stds = jax.random.uniform(k_stds, (D, M), dtype=jnp.float32,
                              minval=0.05, maxval=1.0)
    x = jax.random.normal(k_x, (N, D), dtype=jnp.float32)

    ref = reference_normal_logprob(x, means, stds)

    # Primary (MXU-expansion) path.
    out = jax.block_until_ready(normal_leaf_forward(x, means, stds))
    assert out.shape == (N, D, M)
    # Slightly looser atol covers the MXU's multi-pass f32 decomposition.
    assert jnp.allclose(out, ref, atol=1e-4, rtol=1e-5), "mxu path mismatch vs reference"

    # Fallback (per-feature slice) path, exercised explicitly on the same inputs.
    out_slice = jax.block_until_ready(
        normal_leaf_forward(x, means, stds, impl="slice"))
    assert out_slice.shape == (N, D, M)
    assert jnp.allclose(out_slice, ref, atol=1e-5, rtol=1e-5), "slice path mismatch vs reference"

    print("KERNEL_OK")
</pallas_src>

<mosaic_0001>
module attributes {stable_mosaic.version = 11 : i64} {
  func.func @_normal_logprob_mxu_kernel(%arg0: i32, %arg1: memref<16x16xf32, #tpu.memory_space<vmem>>, %arg2: memref<16x512xf32, #tpu.memory_space<vmem>>, %arg3: memref<3x512xf32, #tpu.memory_space<vmem>>, %arg4: memref<16x512xf32, #tpu.memory_space<vmem>>) attributes {dimension_semantics = [#tpu.dimension_semantics<parallel>], iteration_bounds = array<i64: 3>, scalar_prefetch = 0 : i64, scratch_operands = 0 : i64, tpu.core_type = #tpu.core_type<tc>, window_params = [{transform_indices = @transform_0, window_bounds = array<i64: 16, 16>}, {pipeline_mode = #tpu.pipeline_mode<synchronous>, transform_indices = @transform_1, window_bounds = array<i64: 16, 512>}, {pipeline_mode = #tpu.pipeline_mode<synchronous>, transform_indices = @transform_2, window_bounds = array<i64: 3, 512>}, {transform_indices = @transform_3, window_bounds = array<i64: 16, 512>}]} {
    %c0 = arith.constant 0 : index
    %c0_0 = arith.constant 0 : index
    %0 = vector.load %arg1[%c0, %c0_0] : memref<16x16xf32, #tpu.memory_space<vmem>>, vector<16x16xf32>
    %c0_1 = arith.constant 0 : index
    %c0_2 = arith.constant 0 : index
    %1 = vector.load %arg2[%c0_1, %c0_2] : memref<16x512xf32, #tpu.memory_space<vmem>>, vector<16x512xf32>
    %cst = arith.constant dense<0.000000e+00> : vector<16x512xf32>
    %2 = tpu.matmul %0, %1, %cst {dimension_numbers = #tpu.dot_dimension_numbers<[1], [0], [0], [1], [0, 0, 1, 1], [], []>, precision = #tpu.contract_precision<fp32>} : vector<16x16xf32>, vector<16x512xf32>, vector<16x512xf32> -> vector<16x512xf32>
    %c0_3 = arith.constant 0 : index
    %c0_4 = arith.constant 0 : index
    %3 = vector.load %arg3[%c0_3, %c0_4] : memref<3x512xf32, #tpu.memory_space<vmem>>, vector<1x512xf32>
    %c1 = arith.constant 1 : index
    %c0_5 = arith.constant 0 : index
    %4 = vector.load %arg3[%c1, %c0_5] : memref<3x512xf32, #tpu.memory_space<vmem>>, vector<1x512xf32>
    %c2 = arith.constant 2 : index
    %c0_6 = arith.constant 0 : index
    %5 = vector.load %arg3[%c2, %c0_6] : memref<3x512xf32, #tpu.memory_space<vmem>>, vector<1x512xf32>
    %6 = vector.broadcast %3 : vector<1x512xf32> to vector<16x512xf32>
    %7 = arith.subf %2, %6 : vector<16x512xf32>
    %8 = arith.mulf %7, %7 : vector<16x512xf32>
    %9 = vector.broadcast %4 : vector<1x512xf32> to vector<16x512xf32>
    %10 = arith.mulf %8, %9 : vector<16x512xf32>
    %11 = vector.broadcast %5 : vector<1x512xf32> to vector<16x512xf32>
    %12 = arith.addf %10, %11 : vector<16x512xf32>
    %c0_7 = arith.constant 0 : index
    %c0_8 = arith.constant 0 : index
    %13 = vector.load %arg4[%c0_7, %c0_8] : memref<16x512xf32, #tpu.memory_space<vmem>>, vector<16x512xf32>
    tpu.vector_store %arg4[%c0_7, %c0_8], %12 {strides = array<i32>} : memref<16x512xf32, #tpu.memory_space<vmem>>, vector<16x512xf32>,
    return
  }
  func.func @transform_0(%arg0: i32) -> (i32, i32) {
    %c0_i32 = arith.constant 0 : i32
    %c0_i32_0 = arith.constant 0 : i32
    return %arg0, %c0_i32 : i32, i32
  }
  func.func @transform_1(%arg0: i32) -> (i32, i32) {
    %c0_i32 = arith.constant 0 : i32
    %c0_i32_0 = arith.constant 0 : i32
    %c0_i32_1 = arith.constant 0 : i32
    return %c0_i32, %c0_i32_0 : i32, i32
  }
  func.func @transform_2(%arg0: i32) -> (i32, i32) {
    %c0_i32 = arith.constant 0 : i32
    %c0_i32_0 = arith.constant 0 : i32
    %c0_i32_1 = arith.constant 0 : i32
    return %c0_i32, %c0_i32_0 : i32, i32
  }
  func.func @transform_3(%arg0: i32) -> (i32, i32) {
    %c0_i32 = arith.constant 0 : i32
    %c0_i32_0 = arith.constant 0 : i32
    return %arg0, %c0_i32 : i32, i32
  }
}

</mosaic_0001>

<bundles_post_ra>
// kernel: tpu_custom_call.1
= control target key start
LH: loop header
LB: loop body
LE: loop exit
PB: predicated region body
PF: predicated region fallthrough
CT: control target
= control target key end

     0   :  { %8 = vsyncpa [#allocation3], 0  ;;  %s2073_s0 = inlined_call_operand.vmem [shape: f32[48,16], index: 0, kind: input, shape index: {}]   ;;  %s2074_s1 = inlined_call_operand.vmem [shape: f32[16,512], index: 1, kind: input, shape index: {}]   ;;  %s2075_s2 = inlined_call_operand.hbm [shape: f32[3,512], index: 2, kind: input, shape index: {}]   ;;  %s2076_s3 = inlined_call_operand.hbm [shape: f32[48,512], index: 3, kind: output, shape index: {}]  }
   0x1   :  { %9 = vsyncpa [#allocation4], 0 }
   0x2   :  { %11 = vsyncpa [#allocation4 + $0x1], 0  ;;  %s1758_s12 = smov 0   ;;  %s1760_s13 = smov 0  }
   0x3   :  { %s1762_s14 = smov 0   ;;  %s1764_s15 = smov 0  }
   0x4 LB: > { %s1779_s16 = sadd.s32 4294967295, %s1731_s15   ;;  %s1479_s17 = sadd.s32 4294967294, %s1731_s15   ;;  %s1731_s15 = sphi %s1764_s15, %s2092_s15   ;;  %s1727_s14 = sphi %s1762_s14, %s2091_s14   ;;  %s1723_s13 = sphi %s1760_s13, %s2090_s13   ;;  %s1719_s12 = sphi %s1758_s12, %s2089_s12  }
   0x5   : > { %s1783_s18 = sadd.s32 1, %s1731_s15   ;;  %s92_s19 = sadd.s32 1, %s1727_s14 }
   0x6   : > { %s89_s20 = ssub.s32 %s1731_s15, %s1783_s18  ;;  %p102_p0 = scmp.ne.s32.totalorder %s1727_s14, %s1723_s13 }
   0x7   : > { %p90_p1 = scmp.eq.s32.totalorder %s89_s20, 0  ;;  %p103_p2 = scmp.eq.s32.totalorder %s1779_s16, 2 }
   0x8   : > { %p108_p3 = scmp.ne.s32.totalorder %s1723_s13, %s1719_s12  ;;  %p109_p4 = scmp.eq.s32.totalorder %s1479_s17, 2 }
   0x9   : > { %s1794_s21 = scalar_select %p90_p1, %s1727_s14, %s92_s19  }
   0xa   : > { %p1796_p5 = por %p103_p2, %p102_p0  ;;  %p1800_p6 = por %p109_p4, %p108_p3 }
   0xb   : > { %p1480_p7 = scmp.ge.s32.totalorder %s1731_s15, 1  ;;  %p116_p8 = scmp.lt.s32.totalorder %s1731_s15, 4 }
   0xc   : > { %s2080_s22 = scalar_select %p1796_p5, 1, 0 }
   0xd   : > { %s2081_s23 = scalar_select %p1800_p6, 1, 0 }
   0xe   : > { %p2077_p9 = scmp.eq.s32.totalorder %s1779_s16, 0  ;;  %p1807_p10 = pnand %p1480_p7, %p116_p8 }
   0xf   : > { %s1733_s25 = smov [#allocation2]   ;;  %s1637_s30 = scalar_lea.hbm %s2075_s2, 256 }
  0x10   : > { %s2082_s24 = scalar_select %p1807_p10, 1, 0 }
  0x11   : > { %s132_s26 = sshll.u32 %s1733_s25, 4  ;;  %p1590_p11 = pneg %p1807_p10  ;;  %s133_s26 = int_to_ptr.vmem [resolvable:$true] %s132_s26 }
  0x12   : > { %p1638_p13 = scmp.ne.s32.totalorder %s2075_s2, %s1637_s30  ;;  %p1644_p3 = scmp.lt.u32.totalorder %s1637_s30, %s2075_s2 }
  0x13   : > { %p1815_p12 = pnand %p2077_p9, %p1590_p11 }
  0x15   : > { %p1639_p0 = pneg %p1815_p12 }
  0x17   : > { %p1640_p1 = pnand %p1639_p0, %p1638_p13 }
  0x19   : > { %p1641_p2 = pneg %p1640_p1 }
  0x1b   : > { %p1646_p4 = pnand %p1644_p3, %p1641_p2 }
  0x1d   : > { %1649 = shalt.err (!%p1646_p4)
}
  0x1e   : > { %s1650_s8 = scalar_lea.vmem %s133_s26, 256  ;;  %p1658_p9 = scmp.lt.s32.totalorder %s133_s26, %s133_s26 }
  0x1f   : > { %p1651_p7 = scmp.ne.s32.totalorder %s133_s26, %s1650_s8  ;;  %p1659_p6 = scmp.lt.s32.totalorder %s1650_s8, %s1650_s8 }
  0x21   : > { %p1653_p8 = pnand %p1651_p7, %p1639_p0  ;;  %p1660_p5 = por %p1659_p6, %p1658_p9 }
  0x23   : > { %p1654_p11 = pneg %p1653_p8 }
  0x25   : > { %p1661_p10 = pnand %p1660_p5, %p1654_p11 }
  0x27   : > { %1664 = shalt.err (!%p1661_p10)
}
  0x28   : > { %1593 = dma.hbm_to_vmem [thread:$0]  (!%p1815_p12), %s2075_s2, 256, %s133_s26, [#allocation3]  }
  0x29   : > { %p2084_p13 = scmp.ne.s32.totalorder %s2082_s24, 0 }
  0x2a   : > { %p2085_p1 = scmp.eq.s32.totalorder (!%p2084_p13), %s1779_s16, 0 }
  0x2b   : > { %154 = sbr.rel (%p2084_p13) target bundleno = 351 (0x15f), region = 32 }
  0x32   : > { %1710 = dma.done.wait (%p2085_p1), [#allocation3], 256   ;;  %p2086_p0 = pmov %p2085_p1 }
  0x33   : > { %s1486_s11 = sshll.u32 %s1779_s16, 1  ;;  %v1734_v0 = vmov 0.0   ;;  %v188_v1 = vld [vmem:[%s2074_s1 + $0x8] sm:$0xff]  ;;  %v190_v3 = vld [vmem:[%s2074_s1 + $0x18] sm:$0xff]  ;;  %vm195_vm0 = vcmask 130048   ;;  %v187_v8 = vld [vmem:[%s2074_s1] sm:$0xff] }
  0x34   : > { %1712 = vsyncadd (%p2086_p0), [#allocation3], 4294967040  ;;  %270 = vmatprep.mubr.f32.mxu0 %v1734_v0  ;;  %810 = vmatprep.mubr.f32.mxu1 %v1734_v0  ;;  %p179_p5 = scmp.lt.s32.totalorder %s1486_s11, 5  ;;  %v192_v2 = vld [vmem:[%s2074_s1 + $0x28] sm:$0xff]  ;;  %v202_v4 = vand.u32 4294901760, %v188_v1  ;;  %v194_v6 = vld [vmem:[%s2074_s1 + $0x38] sm:$0xff] }
  0x35   : > { %v206_v5 = vand.u32 4294901760, %v192_v2  ;;  %v742_v7 = vand.u32 4294901760, %v190_v3  ;;  %v191_v9 = vld [vmem:[%s2074_s1 + $0x20] sm:$0xff]  ;;  %v746_v10 = vand.u32 4294901760, %v194_v6  ;;  %v204_v11 = vand.u32 4294901760, %v187_v8  ;;  %v189_v13 = vld [vmem:[%s2074_s1 + $0x10] sm:$0xff] }
  0x36   : > { %s2094_s11 = smov (!%p179_p5, %s1486_s11), 5  ;;  %v208_v12 = vand.u32 4294901760, %v191_v9  ;;  %v193_v14 = vld [vmem:[%s2074_s1 + $0x30] sm:$0xff]  ;;  %v1876_v17 = vsub.f32 %v188_v1, %v202_v4  ;;  %v744_v25 = vand.u32 4294901760, %v189_v13  ;;  %s175_s20 = sand.u32 1, %s1723_s13  }
  0x37   : > { %s1487_s17 = sshll.u32 %s2094_s11, 3  ;;  %v1874_v16 = vpack.c.bf16 %v206_v5, %v202_v4  ;;  %v1878_v18 = vsub.f32 %v192_v2, %v206_v5  ;;  %v1880_v19 = vsub.f32 %v190_v3, %v742_v7  ;;  %v1882_v20 = vpack.c.bf16 %v746_v10, %v742_v7  ;;  %s1495_s25 = sshll.u32 %s1779_s16, 10 }
  0x38   : > { %s1847_s24 = scalar_lea.vmem %s2073_s0, %s1487_s17  ;;  %v1884_v21 = vsub.f32 %v194_v6, %v746_v10  ;;  %v1886_v22 = vpack.c.bf16 %v208_v12, %v204_v11  ;;  %v1888_v23 = vsub.f32 %v187_v8, %v204_v11  ;;  %v1891_v24 = vsub.f32 %v191_v9, %v208_v12  ;;  %s2026_s30 = scalar_lea.hbm %s2076_s3, %s1495_s25 }
  0x39   : > { %v185_v15 = vld [vmem:[%s1847_s24] sm:$0xff]  ;;  %1497 = vmatprep.subr.bf16.mxu0 %v1874_v16  ;;  %v748_v26 = vand.u32 4294901760, %v193_v14  ;;  %1521 = vmatprep.subr.bf16.mxu1 %v1882_v20  ;;  %v295_v29 = vand.u32 4294901760, %v1876_v17  ;;  %v307_v30 = vand.u32 4294901760, %v1878_v18  ;;  %v835_v31 = vand.u32 4294901760, %v1880_v19  ;;  %v186_v44 = vld [vmem:[%s1847_s24 + $0x8] sm:$0xff] }
  0x3a   : > { %v197_v27 = vsel %vm195_vm0, %v185_v15, 0  ;;  %1499 = vmatpush1.bf16.msra.mxu0 %v1886_v22  ;;  %v1903_v33 = vsub.f32 %v189_v13, %v744_v25  ;;  %v847_v35 = vand.u32 4294901760, %v1884_v21  ;;  %v301_v41 = vand.u32 4294901760, %v1888_v23  ;;  %s2019_s24 = sshll.u32 %s175_s20, 6  ;;  %s2032_s16 = scalar_lea.sflag [#allocation4], %s175_s20 }
  0x3b   : > { %v1896_v28 = vand.u32 4294901760, %v197_v27  ;;  %v1901_v32 = vpack.c.bf16 %v748_v26, %v744_v25  ;;  %v1905_v34 = vsub.f32 %v193_v14, %v748_v26  ;;  %v296_v37 = vsub.f32 %v1876_v17, %v295_v29  ;;  %v1284_v25 = vld [vmem:[#allocation2 + $0x1] ss:$4 sm:$0xf]  ;;  %s177_s26 = scalar_lea.vmem [#allocation5], %s2019_s24  ;;  %p2087_p9 = scmp.ne.s32.totalorder %s2080_s22, 0 }
  0x3c   : > { %v308_v38 = vsub.f32 %v1878_v18, %v307_v30  ;;  %v836_v39 = vsub.f32 %v1880_v19, %v835_v31  ;;  %v848_v40 = vsub.f32 %v1884_v21, %v847_v35  ;;  %v313_v42 = vand.u32 4294901760, %v1891_v24  ;;  %s1405_s27 = sshll.u32 %s177_s26, 4  ;;  %s1735_s5 = smov [#allocation5]   ;;  %s2028_s27 = int_to_ptr.vmem [resolvable:$true] %s1405_s27 }
  0x3d   : > { %v1909_v36 = vsub.f32 %v197_v27, %v1896_v28  ;;  %1523 = vmatpush1.bf16.msra.mxu1 %v1901_v32  ;;  %v841_v43 = vand.u32 4294901760, %v1903_v33  ;;  %v297_v46 = vand.u32 4294901760, %v296_v37  ;;  %v302_v50 = vsub.f32 %v1888_v23, %v301_v41  ;;  %s1665_s4 = scalar_lea.vmem %s2028_s27, 1024  ;;  %s1669_s6 = sshll.u32 %s1735_s5, 4  ;;  %s1670_s6 = int_to_ptr.vmem [resolvable:$false] %s1669_s6 }
  0x3e   : > { %v309_v47 = vand.u32 4294901760, %v308_v38  ;;  %v837_v48 = vand.u32 4294901760, %v836_v39  ;;  %v849_v49 = vand.u32 4294901760, %v848_v40  ;;  %v314_v51 = vsub.f32 %v1891_v24, %v313_v42  ;;  %p1666_p6 = scmp.ne.s32.totalorder %s2028_s27, %s1665_s4  ;;  %s1671_s7 = scalar_lea.vmem %s1670_s6, 2048 }
  0x3f   : > { %v1929_v45 = vand.u32 4294901760, %v1909_v36  ;;  %v842_v52 = vsub.f32 %v1903_v33, %v841_v43  ;;  %v853_v55 = vand.u32 4294901760, %v1905_v34  ;;  %v200_v56 = vsel %vm195_vm0, %v186_v44, 0  ;;  %p1672_p2 = scmp.lt.s32.totalorder %s2028_s27, %s1670_s6  ;;  %p1673_p3 = scmp.lt.s32.totalorder %s1671_s7, %s1665_s4 }
  0x40   : > { %v1500_v54 = vpack.c.bf16 %v309_v47, %v297_v46  ;;  %v1524_v57 = vpack.c.bf16 %v849_v49, %v837_v48  ;;  %v303_v58 = vand.u32 4294901760, %v302_v50  ;;  %v315_v59 = vand.u32 4294901760, %v314_v51  ;;  %p1667_p10 = pnand %p1666_p6, %p2087_p9 }
  0x41   : > { %v274_v53 = vsub.f32 %v1909_v36, %v1929_v45  ;;  %v843_v60 = vand.u32 4294901760, %v842_v52  ;;  %v854_v62 = vsub.f32 %v1905_v34, %v853_v55  ;;  %v1945_v63 = vand.u32 4294901760, %v200_v56  ;;  %p1674_p4 = por %p1673_p3, %p1672_p2 }
  0x42   : > { %1501 = vmatprep.subr.bf16.mxu0 %v1500_v54  ;;  %v1504_v1 = vpack.c.bf16 %v1878_v18, %v1876_v17  ;;  %1525 = vmatprep.subr.bf16.mxu1 %v1524_v57  ;;  %v1502_v2 = vpack.c.bf16 %v315_v59, %v303_v58  ;;  %v1528_v5 = vpack.c.bf16 %v1884_v21, %v1880_v19  ;;  %p1668_p12 = pneg %p1667_p10 }
  0x43   : > { %v275_v61 = vand.u32 4294901760, %v274_v53  ;;  %v855_v3 = vand.u32 4294901760, %v854_v62  ;;  %v283_v4 = vsub.f32 %v200_v56, %v1945_v63  ;;  %v1506_v10 = vpack.c.bf16 %v1891_v24, %v1888_v23 }
  0x44   : > { %v1530_v11 = vpack.c.bf16 %v1905_v34, %v1903_v33  ;;  %v1512_v12 = vpack.c.bf16 %v307_v30, %v295_v29  ;;  %v1536_v13 = vpack.c.bf16 %v847_v35, %v835_v31  ;;  %v1514_v14 = vpack.c.bf16 %v313_v42, %v301_v41  ;;  %p1675_p7 = pnand %p1674_p4, %p1668_p12 }
  0x45   : > { %276 = vmatmul.mubr.f32.vlgmr.msra.gmra.mrb[0].mxu0 %v275_v61  ;;  %816 = vmatmul.mubr.f32.vlgmr.msra.gmra.mrb[0].mxu1 %v275_v61  ;;  %v1526_v6 = vpack.c.bf16 %v855_v3, %v843_v60  ;;  %v284_v7 = vand.u32 4294901760, %v283_v4  ;;  %v1538_v15 = vpack.c.bf16 %v853_v55, %v841_v43 }
  0x46   : > { %1503 = vmatpush1.bf16.msra.mxu0 %v1502_v2  ;;  %281 = vmatprep.mubr.f32.mxu0 %v1734_v0 }
  0x47   : > { %821 = vmatprep.mubr.f32.mxu1 %v1734_v0  ;;  %1505 = vmatprep.subr.bf16.mxu0 %v1504_v1  ;;  %v285_v8 = vsub.f32 %v283_v4, %v284_v7 }
  0x48   : > { %1527 = vmatpush1.bf16.msra.mxu1 %v1526_v6 }
  0x49   : > { %1529 = vmatprep.subr.bf16.mxu1 %v1528_v5  ;;  %v286_v9 = vand.u32 4294901760, %v285_v8 }
  0x4b   : > { %287 = vmatmul.mubr.f32.gmra.mrb[2].mxu0 %v286_v9  ;;  %827 = vmatmul.mubr.f32.gmra.mrb[2].mxu1 %v286_v9 }
  0x4c   : > { %377 = vmatprep.mubr.f32.mxu0 %v1734_v0  ;;  %917 = vmatprep.mubr.f32.mxu1 %v1734_v0 }
  0x4f   : > { %379 = vmatmul.mubr.f32.vlgmr.msra.gmra.mrb[0].mxu0 %v1896_v28  ;;  %919 = vmatmul.mubr.f32.vlgmr.msra.gmra.mrb[0].mxu1 %v1896_v28 }
  0x50   : > { %1507 = vmatpush1.bf16.msra.mxu0 %v1506_v10  ;;  %1531 = vmatpush1.bf16.msra.mxu1 %v1530_v11 }
  0x51   : > { %384 = vmatprep.mubr.f32.mxu0 %v1734_v0  ;;  %924 = vmatprep.mubr.f32.mxu1 %v1734_v0 }
  0x52   : > { %1509 = vmatprep.subr.bf16.mxu0 %v1874_v16  ;;  %1533 = vmatprep.subr.bf16.mxu1 %v1882_v20 }
  0x53   : > { %386 = vmatmul.mubr.f32.gmra.mrb[2].mxu0 %v1945_v63  ;;  %926 = vmatmul.mubr.f32.gmra.mrb[2].mxu1 %v1945_v63 }
  0x54   : > { %464 = vmatprep.mubr.f32.mxu0 %v1734_v0  ;;  %1004 = vmatprep.mubr.f32.mxu1 %v1734_v0 }
  0x57   : > { %467 = vmatmul.mubr.f32.vlgmr.msra.gmra.mrb[0].mxu0 %v1909_v36  ;;  %1007 = vmatmul.mubr.f32.vlgmr.msra.gmra.mrb[0].mxu1 %v1909_v36 }
  0x58   : > { %1511 = vmatpush1.bf16.msra.mxu0 %v1886_v22  ;;  %1535 = vmatpush1.bf16.msra.mxu1 %v1901_v32 }
  0x59   : > { %472 = vmatprep.mubr.f32.mxu0 %v1734_v0  ;;  %1012 = vmatprep.mubr.f32.mxu1 %v1734_v0 }
  0x5a   : > { %1513 = vmatprep.subr.bf16.mxu0 %v1512_v12  ;;  %1537 = vmatprep.subr.bf16.mxu1 %v1536_v13 }
  0x5b   : > { %475 = vmatmul.mubr.f32.gmra.mrb[2].mxu0 %v283_v4  ;;  %1015 = vmatmul.mubr.f32.gmra.mrb[2].mxu1 %v283_v4 }
  0x5c   : > { %549 = vmatprep.mubr.f32.mxu0 %v1734_v0  ;;  %1089 = vmatprep.mubr.f32.mxu1 %v1734_v0 }
  0x5f   : > { %553 = vmatmul.mubr.f32.vlgmr.msra.gmra.mrb[0].mxu0 %v1929_v45  ;;  %1093 = vmatmul.mubr.f32.vlgmr.msra.gmra.mrb[0].mxu1 %v1929_v45 }
  0x60   : > { %1515 = vmatpush1.bf16.msra.mxu0 %v1514_v14  ;;  %1539 = vmatpush1.bf16.msra.mxu1 %v1538_v15 }
  0x61   : > { %558 = vmatprep.mubr.f32.mxu0 %v1734_v0  ;;  %1098 = vmatprep.mubr.f32.mxu1 %v1734_v0 }
  0x62   : > { %1517 = vmatprep.subr.bf16.mxu0 %v1874_v16  ;;  %1541 = vmatprep.subr.bf16.mxu1 %v1882_v20  ;;  %v1288_v16 = vlaneseq  ;;  %v1282_v20 = vld [vmem:[#allocation2] ss:$4 sm:$0xf] }
  0x63   : > { %562 = vmatmul.mubr.f32.gmra.mrb[2].mxu0 %v284_v7  ;;  %1102 = vmatmul.mubr.f32.gmra.mrb[2].mxu1 %v284_v7 }
  0x64   : > { %644 = vmatprep.mubr.f32.mxu0 %v1734_v0  ;;  %1184 = vmatprep.mubr.f32.mxu1 %v1734_v0  ;;  %v1289_v17 = vshrl.u32 %v1288_v16, 7 }
  0x66   : > { %v1290_v18 = vsub.s32 0, %v1289_v17  ;;  %v1298_v19 = vsub.s32 2, %v1289_v17  ;;  %v1294_v21 = vsub.s32 1, %v1289_v17 }
  0x67   : > { %646 = vmatmul.mubr.f32.vlgmr.msra.gmra.mrb[0].mxu0 %v1896_v28  ;;  %1186 = vmatmul.mubr.f32.vlgmr.msra.gmra.mrb[0].mxu1 %v1896_v28 }
  0x68   : > { %1519 = vmatpush1.bf16.msra.mxu0 %v1886_v22  ;;  %1543 = vmatpush1.bf16.msra.mxu1 %v1901_v32  ;;  %v1302_v22 = vsub.s32 3, %v1289_v17  ;;  %v1291_v23 = vrot.slane %v1282_v20, %v1290_v18  ;;  %v1299_v24 = vrot.slane %v1282_v20, %v1298_v19  ;;  %v1295_v26 = vrot.slane %v1282_v20, %v1294_v21 }
  0x69   : > { %651 = vmatprep.mubr.f32.mxu0 %v1734_v0  ;;  %1191 = vmatprep.mubr.f32.mxu1 %v1734_v0  ;;  %v1328_v31 = vrot.slane %v1284_v25, %v1290_v18  ;;  %v1336_v33 = vrot.slane %v1284_v25, %v1298_v19  ;;  %v1332_v37 = vrot.slane %v1284_v25, %v1294_v21 }
  0x6a   : > { %v1303_v27 = vrot.slane %v1282_v20, %v1302_v22  ;;  %v1340_v39 = vrot.slane %v1284_v25, %v1302_v22 }
  0x6b   : > { %653 = vmatmul.mubr.f32.gmra.mrb[2].mxu0 %v1945_v63  ;;  %1193 = vmatmul.mubr.f32.gmra.mrb[2].mxu1 %v1945_v63 }
  0x6c   : > { %727 = vmatprep.mubr.f32.mxu0 %v1734_v0  ;;  %1267 = vmatprep.mubr.f32.mxu1 %v1734_v0 }
  0x6f   : > { %729 = vmatmul.mubr.f32.vlgmr.msra.gmra.mrb[0].mxu0 %v1896_v28  ;;  %1269 = vmatmul.mubr.f32.vlgmr.msra.gmra.mrb[0].mxu1 %v1896_v28 }
  0x70   : > { %734 = vmatprep.mubr.f32.mxu0 %v1734_v0  ;;  %1274 = vmatprep.mubr.f32.mxu1 %v1734_v0  ;;  %v1286_v0 = vld [vmem:[#allocation2 + $0x2] ss:$4 sm:$0xf] }
  0x71   : > { %v1357_v41 = vrot.slane %v1286_v0, %v1290_v18  ;;  %v1365_v43 = vrot.slane %v1286_v0, %v1298_v19  ;;  %v1361_v45 = vrot.slane %v1286_v0, %v1294_v21  ;;  %v1369_v47 = vrot.slane %v1286_v0, %v1302_v22 }
  0x73   : > { %736 = vmatmul.mubr.f32.gmra.mrb[2].mxu0 %v1945_v63  ;;  %1276 = vmatmul.mubr.f32.gmra.mrb[2].mxu1 %v1945_v63 }
 0x142   : > { %v730_v28 = vpop.f32.mrb[0].mxu0  ;;  %v1270_v29 = vpop.f32.mrb[0].mxu1 }
 0x143   : > { %v1308_v30 = vsub.f32 %v730_v28, %v1291_v23  ;;  %v1310_v32 = vsub.f32 %v1270_v29, %v1299_v24  ;;  %v732_v34 = vpop.f32.mrb[1].mxu0  ;;  %v1272_v35 = vpop.f32.mrb[1].mxu1 }
 0x144   : > { %v1309_v36 = vsub.f32 %v732_v34, %v1295_v26  ;;  %v1311_v38 = vsub.f32 %v1272_v35, %v1303_v27 }
 0x145   : > { %v1316_v40 = vmul.f32 %v1308_v30, %v1308_v30  ;;  %v1318_v42 = vmul.f32 %v1310_v32, %v1310_v32 }
 0x146   : > { %v1317_v44 = vmul.f32 %v1309_v36, %v1309_v36  ;;  %v1319_v46 = vmul.f32 %v1311_v38, %v1311_v38  ;;  %v737_v48 = vpop.f32.mrb[2].mxu0  ;;  %v1277_v49 = vpop.f32.mrb[2].mxu1 }
 0x147   : > { %v1345_v50 = vmul.f32 %v1328_v31, %v1316_v40  ;;  %v1347_v51 = vmul.f32 %v1336_v33, %v1318_v42  ;;  %v1312_v52 = vsub.f32 %v737_v48, %v1291_v23  ;;  %v1314_v53 = vsub.f32 %v1277_v49, %v1299_v24  ;;  %v739_v54 = vpop.f32.mrb[3].mxu0  ;;  %v1279_v55 = vpop.f32.mrb[3].mxu1 }
 0x148   : > { %v1346_v56 = vmul.f32 %v1332_v37, %v1317_v44  ;;  %v1348_v57 = vmul.f32 %v1340_v39, %v1319_v46  ;;  %v1313_v58 = vsub.f32 %v739_v54, %v1295_v26  ;;  %v1315_v59 = vsub.f32 %v1279_v55, %v1303_v27 }
 0x149   : > { %v1374_v60 = vadd.f32 %v1357_v41, %v1345_v50  ;;  %v1376_v61 = vadd.f32 %v1365_v43, %v1347_v51  ;;  %v1320_v62 = vmul.f32 %v1312_v52, %v1312_v52  ;;  %v1322_v63 = vmul.f32 %v1314_v53, %v1314_v53 }
 0x14a   : > { %v1375_v1 = vadd.f32 %v1361_v45, %v1346_v56  ;;  %v1377_v2 = vadd.f32 %v1369_v47, %v1348_v57  ;;  %v1321_v3 = vmul.f32 %v1313_v58, %v1313_v58  ;;  %v1323_v4 = vmul.f32 %v1315_v59, %v1315_v59 }
 0x14b   : > { %1382 = vst [vmem:[%s177_s26] sm:$0xff] %v1374_v60  ;;  %1384 = vst [vmem:[%s177_s26 + $0x10] sm:$0xff] %v1376_v61  ;;  %v1349_v5 = vmul.f32 %v1328_v31, %v1320_v62  ;;  %v1351_v6 = vmul.f32 %v1336_v33, %v1322_v63 }
 0x14c   : > { %1383 = vst [vmem:[%s177_s26 + $0x8] sm:$0xff] %v1375_v1  ;;  %1385 = vst [vmem:[%s177_s26 + $0x18] sm:$0xff] %v1377_v2  ;;  %v1350_v7 = vmul.f32 %v1332_v37, %v1321_v3  ;;  %v1352_v8 = vmul.f32 %v1340_v39, %v1323_v4 }
 0x14d   : > { %v1378_v9 = vadd.f32 %v1357_v41, %v1349_v5  ;;  %v1380_v10 = vadd.f32 %v1365_v43, %v1351_v6 }
 0x14e   : > { %v1379_v11 = vadd.f32 %v1361_v45, %v1350_v7  ;;  %v1381_v12 = vadd.f32 %v1369_v47, %v1352_v8 }
 0x14f   : > { %1386 = vst [vmem:[%s177_s26 + $0x20] sm:$0xff] %v1378_v9  ;;  %1388 = vst [vmem:[%s177_s26 + $0x30] sm:$0xff] %v1380_v10 }
 0x150   : > { %1387 = vst [vmem:[%s177_s26 + $0x28] sm:$0xff] %v1379_v11  ;;  %1389 = vst [vmem:[%s177_s26 + $0x38] sm:$0xff] %v1381_v12 }
 0x151   : > { %1678 = shalt.err (!%p1675_p7)
}
 0x152   : > { %s1679_s8 = scalar_lea.hbm %s2026_s30, 1024  ;;  %s1683_s11 = scalar_lea.hbm %s2076_s3, 3072 }
 0x153   : > { %p1680_p8 = scmp.ne.s32.totalorder %s2026_s30, %s1679_s8  ;;  %p1684_p1 = scmp.lt.u32.totalorder %s2026_s30, %s2076_s3 }
 0x154   : > { %p1685_p0 = scmp.lt.u32.totalorder %s1683_s11, %s1679_s8  ;;  %p1687_p6 = scmp.lt.u32.totalorder %s1679_s8, %s2026_s30 }
 0x155   : > { %p1681_p11 = pnand %p1680_p8, %p2087_p9 }
 0x156   : > { %p1686_p5 = por %p1685_p0, %p1684_p1 }
 0x157   : > { %p1682_p13 = pneg %p1681_p11 }
 0x158   : > { %p1688_p10 = por %p1687_p6, %p1686_p5 }
 0x15a   : > { %p1689_p12 = pnand %p1688_p10, %p1682_p13 }
 0x15c   : > { %1692 = shalt.err (!%p1689_p12)
}
 0x15d   : > { %s1736_s20 = smov 512   ;;  %s1737_s24 = smov 32  }
 0x15e   : > { %1588 = dma.vmem_to_hbm [thread:$0]  (%p2087_p9), %s2028_s27, 1024, %s2026_s30, %s2032_s16, %s1736_s20, %s1736_s20, %s1737_s24  }
 0x15f PF: > { %p1600_p2 = scmp.ge.s32.totalorder %s1731_s15, 2  ;;  %s1420_s25 = sand.u32 1, %s1719_s12  }
 0x160   : > { %p2088_p3 = scmp.ne.s32.totalorder %s2081_s23, 0  ;;  %s1421_s26 = scalar_lea.sflag [#allocation4], %s1420_s25 }
 0x162   : > { %p1595_p4 = pnand %p1600_p2, %p2088_p3 }
 0x164   : > { %1714 = dma.done.wait (!%p1595_p4), %s1421_s26, 1024  }
 0x165   : > { %1716 = vsyncadd (!%p1595_p4), %s1421_s26, 4294966272  ;;  %p14_p7 = scmp.ge.s32.totalorder %s1783_s18, 5   ;;  %s2089_s12 = smov %s1723_s13 }
 0x166   : > { %s2090_s13 = smov %s1727_s14  ;;  %s2091_s14 = smov %s1794_s21 }
 0x167   : > { %s2092_s15 = smov %s1783_s18  ;;  %16 = sbr.rel (!%p14_p7) target bundleno = 4 (0x4), region = 74 }
 0x16e   :  { %1426 = vsyncpa [#allocation3], 1 }
 0x16f   :  { %1428 = vsyncpa [#allocation3 + $0x1], 1 }
 0x170   :  { %1429 = vsyncpa [#allocation4], 1 }
 0x171   :  { %1431 = vsyncpa [#allocation4 + $0x1], 1 }

</bundles_post_ra>
